<compile_context>
chip_gen: v7x
topology: tpu7x:2x2x1
jax: 0.10.0
libtpu: 0.0.40
codegen_flags: <defaults>
</compile_context>

<pallas_src>
import functools

import jax
import jax.numpy as jnp
from jax import lax
from jax.experimental import pallas as pl
from jax.experimental.pallas import tpu as pltpu


def _round_up(x, m):
    return ((x + m - 1) // m) * m


# ----------------------------- config ---------------------------------------
class Config:
    hidden_size = 32
    tree_depth = 3
    node_degree = (2, 3, 4)
    vocab_size = 50
    magnitude_size = 10
    precision_size = 10
    top_digit_size = 10
    low_digit_size = 10
    max_cell_length = 16
    row_size = 16
    column_size = 16
    num_format_feature = 11
    layer_norm_eps = 1e-6
    hidden_dropout_prob = 0.0  # eval-mode dropout == identity


# ----------------------------- Pallas kernel --------------------------------
def _embed_ln_kernel(token_ref, numeric_ref, order_ref, poscat_ref, fmt_ref,
                     wbd_ref, avg_ref, gamma_ref, beta_ref, out_ref, *, eps):
    # format Linear, lane-packed:
    #   [R, 4*Fp] @ block_diag(W^T, x4) -> [R, 128]   (MXU)
    fmt_states = jnp.dot(fmt_ref[...], wbd_ref[...],
                         preferred_element_type=jnp.float32)

    # string_states + position_states + format_states (f32 accumulation,
    # bf16 transit for the four gathered streams).
    x = (token_ref[...].astype(jnp.float32)
         + numeric_ref[...].astype(jnp.float32)
         + order_ref[...].astype(jnp.float32)
         + poscat_ref[...].astype(jnp.float32)
         + fmt_states)

    # Segmented LayerNorm: each 32-lane segment of a 128-lane row is one
    # token.  Per-segment mean/var via a block-diagonal averaging matmul
    # (result is already broadcast across the segment's 32 lanes).
    mean = jnp.dot(x, avg_ref[...], preferred_element_type=jnp.float32)
    xc = x - mean
    var = jnp.dot(xc * xc, avg_ref[...], preferred_element_type=jnp.float32)
    inv = lax.rsqrt(var + eps)          # biased variance, eps inside rsqrt
    y = xc * inv * gamma_ref[...] + beta_ref[...]

    # TODO(synk): dropout is identity here (eval mode / p=0.0).
    out_ref[...] = y.astype(out_ref.dtype)


def embed_layernorm_pallas(token_states, numeric_states, order_states,
                           poscat_states, format_vec, format_w_t,
                           gamma, beta, *, eps, block_rows=2048):
    """Fused adds + format Linear + LayerNorm, 4 tokens packed per 128 lanes.

    token/numeric/order/poscat: [B,S,H] (H==32); format_vec: [B,S,F];
    format_w_t: [F,H]; gamma/beta: [H].
    `block_rows` counts PACKED rows (1 packed row = 4 tokens); default 2048
    packed rows = 8192 tokens per grid step (~3.7 MB/step, sweepable).
    Returns [B,S,H] float32.
    """
    B, S, H = token_states.shape
    F = format_vec.shape[-1]
    assert H == 32, "lane packing below assumes hidden_size == 32"
    PACK = 128 // H                     # 4 tokens per vreg row
    HP = PACK * H                       # 128 lanes
    Fp = _round_up(F, 8)                # sublane-aligned contraction (11 -> 16)
    FP = PACK * Fp                      # 64

    rows = B * S
    rp = pl.cdiv(rows, PACK)                           # packed rows
    block_rp = _round_up(min(block_rows, _round_up(rp, 8)), 8)
    rp_pad = _round_up(rp, block_rp)
    rows_pad = rp_pad * PACK

    def pack(x, width, dtype):
        x2 = x.reshape(rows, width)
        x2 = jnp.pad(x2, ((0, rows_pad - rows), (0, 0)))
        return x2.reshape(rp_pad, PACK * width).astype(dtype)

    # bf16 transit for the four additive streams (halves input HBM bytes).
    t2 = pack(token_states, H, jnp.bfloat16)
    n2 = pack(numeric_states, H, jnp.bfloat16)
    o2 = pack(order_states, H, jnp.bfloat16)
    p2 = pack(poscat_states, H, jnp.bfloat16)

    # format features: pad F -> Fp, keep f32, lane-pack to [rp_pad, 4*Fp].
    f2 = format_vec.reshape(rows, F).astype(jnp.float32)
    f2 = jnp.pad(f2, ((0, rows_pad - rows), (0, Fp - F)))
    f2 = f2.reshape(rp_pad, FP)

    # Block-diagonal (x PACK) format weight and 32-lane averaging matrix.
    w_pad = jnp.pad(format_w_t.astype(jnp.float32), ((0, Fp - F), (0, 0)))
    eye_p = jnp.eye(PACK, dtype=jnp.float32)
    wbd = jnp.kron(eye_p, w_pad)                                     # [64, 128]
    avg = jnp.kron(eye_p, jnp.full((H, H), 1.0 / H, jnp.float32))    # [128,128]

    g2 = jnp.tile(gamma.astype(jnp.float32), PACK).reshape(1, HP)
    b2 = jnp.tile(beta.astype(jnp.float32), PACK).reshape(1, HP)

    row_h = pl.BlockSpec((block_rp, HP), lambda i: (i, 0))
    row_f = pl.BlockSpec((block_rp, FP), lambda i: (i, 0))
    const = lambda shape: pl.BlockSpec(shape, lambda i: (0, 0))

    # Scoped-VMEM request from the actual tile footprint (double-buffered),
    # capped at 32 MiB so it is valid on v7x (64 MiB physical / 32 MiB scoped).
    tile_bytes = block_rp * (4 * HP * 2 + FP * 4 + HP * 4)
    vmem_limit = int(min(32 * 1024 * 1024,
                         max(4 * tile_bytes, 8 * 1024 * 1024)))

    out = pl.pallas_call(
        functools.partial(_embed_ln_kernel, eps=eps),
        out_shape=jax.ShapeDtypeStruct((rp_pad, HP), jnp.float32),
        grid_spec=pltpu.PrefetchScalarGridSpec(
            num_scalar_prefetch=0,
            grid=(rp_pad // block_rp,),
            in_specs=[row_h, row_h, row_h, row_h, row_f,
                      const((FP, HP)), const((HP, HP)),
                      const((1, HP)), const((1, HP))],
            out_specs=row_h,
        ),
        compiler_params=pltpu.CompilerParams(
            dimension_semantics=("parallel",),
            vmem_limit_bytes=vmem_limit),
    )(t2, n2, o2, p2, f2, wbd, avg, g2, b2)

    return out.reshape(rows_pad, H)[:rows].reshape(B, S, H)


# ----------------------------- module wrapper --------------------------------
class EmbeddingForTutaPallas:
    def __init__(self, config, key):
        H = config.hidden_size
        self.hidden_size = H
        self.quad = H // 4
        self.layout_size = H // 4
        self.tree_size = H - self.layout_size
        self.uni_layout = self.layout_size // 2
        self.uni_tree = self.tree_size // (config.tree_depth * 2)
        self.tree_depth = config.tree_depth
        self.total_node = sum(config.node_degree) + 1
        self.eps = config.layer_norm_eps

        keys = jax.random.split(key, 12)

        def emb(k, n, d):
            return jax.random.normal(k, (n, d), jnp.float32) * 0.02

        self.token_w = emb(keys[0], config.vocab_size, H)
        self.mag_w = emb(keys[1], config.magnitude_size + 2, self.quad)
        self.pre_w = emb(keys[2], config.precision_size + 2, self.quad)
        self.top_w = emb(keys[3], config.top_digit_size + 2, self.quad)
        self.low_w = emb(keys[4], config.low_digit_size + 2, self.quad)
        self.order_w = emb(keys[5], config.max_cell_length, H)
        self.row_w = emb(keys[6], config.row_size + 1, self.uni_layout)
        self.col_w = emb(keys[7], config.column_size + 1, self.uni_layout)
        self.top_tree_w = emb(keys[8], self.total_node, self.uni_tree)
        self.left_tree_w = emb(keys[9], self.total_node, self.uni_tree)
        # nn.Linear(F, H, bias=False): weight is (H, F); forward = x @ W.T
        self.format_w = emb(keys[10], H, config.num_format_feature)
        self.ln_gamma = jnp.ones((H,), jnp.float32)
        self.ln_beta = jnp.zeros((H,), jnp.float32)

    def __call__(self, token_id, num_mag, num_pre, num_top, num_low, order,
                 pos_row, pos_col, pos_top, pos_left, format_vec,
                 block_rows=2048):
        B, S = order.shape
        take = lambda tbl, idx: jnp.take(tbl, idx, axis=0)

        token_states = take(self.token_w, token_id)               # (B,S,H)
        numeric_states = jnp.concatenate(
            [take(self.mag_w, num_mag), take(self.pre_w, num_pre),
             take(self.top_w, num_top), take(self.low_w, num_low)],
            axis=2)                                               # (B,S,H)

        order_states = take(self.order_w, order)                  # (B,S,H)
        row_states = take(self.row_w, pos_row)                    # (B,S,uL)
        col_states = take(self.col_w, pos_col)                    # (B,S,uL)
        left_tree = take(self.left_tree_w, pos_left).reshape(B, S, -1)
        top_tree = take(self.top_tree_w, pos_top).reshape(B, S, -1)
        poscat_states = jnp.concatenate(
            [row_states, left_tree, col_states, top_tree], axis=-1)  # (B,S,H)

        return embed_layernorm_pallas(
            token_states, numeric_states, order_states, poscat_states,
            format_vec, self.format_w.T, self.ln_gamma, self.ln_beta,
            eps=self.eps, block_rows=block_rows)


# ----------------------------- pure-JAX reference ----------------------------
def _reference(mod, *args):
    (token_id, num_mag, num_pre, num_top, num_low, order,
     pos_row, pos_col, pos_top, pos_left, format_vec) = args
    B, S = order.shape
    take = lambda tbl, idx: jnp.take(tbl, idx, axis=0)
    string = take(mod.token_w, token_id) + jnp.concatenate(
        [take(mod.mag_w, num_mag), take(mod.pre_w, num_pre),
         take(mod.top_w, num_top), take(mod.low_w, num_low)], axis=2)
    position = take(mod.order_w, order) + jnp.concatenate(
        [take(mod.row_w, pos_row),
         take(mod.left_tree_w, pos_left).reshape(B, S, -1),
         take(mod.col_w, pos_col),
         take(mod.top_tree_w, pos_top).reshape(B, S, -1)], axis=-1)
    fmt = format_vec @ mod.format_w.T
    x = string + position + fmt
    mean = jnp.mean(x, -1, keepdims=True)
    var = jnp.mean((x - mean) ** 2, -1, keepdims=True)
    return (x - mean) * lax.rsqrt(var + mod.eps) * mod.ln_gamma + mod.ln_beta


def _make_inputs(key, cfg, mod, B, S):
    ks = jax.random.split(key, 11)
    ri = lambda k, hi, shape: jax.random.randint(k, shape, 0, hi, jnp.int32)
    token_id = ri(ks[0], cfg.vocab_size, (B, S))
    num_mag = ri(ks[1], cfg.magnitude_size + 2, (B, S))
    num_pre = ri(ks[2], cfg.precision_size + 2, (B, S))
    num_top = ri(ks[3], cfg.top_digit_size + 2, (B, S))
    num_low = ri(ks[4], cfg.low_digit_size + 2, (B, S))
    order = ri(ks[5], cfg.max_cell_length, (B, S))
    pos_row = ri(ks[6], cfg.row_size + 1, (B, S))
    pos_col = ri(ks[7], cfg.column_size + 1, (B, S))
    pos_top = ri(ks[8], mod.total_node, (B, S, cfg.tree_depth))
    pos_left = ri(ks[9], mod.total_node, (B, S, cfg.tree_depth))
    format_vec = jax.random.normal(ks[10], (B, S, cfg.num_format_feature),
                                   jnp.float32)
    return (token_id, num_mag, num_pre, num_top, num_low, order,
            pos_row, pos_col, pos_top, pos_left, format_vec)


# ----------------------------- main ------------------------------------------
if __name__ == "__main__":
    cfg = Config()
    key = jax.random.PRNGKey(0)
    kparam, kin1, kin2 = jax.random.split(key, 3)
    mod = EmbeddingForTutaPallas(cfg, kparam)

    # Primary small-shape check (single tile, auto-shrunk block).
    B, S = 2, 8
    args = _make_inputs(kin1, cfg, mod, B, S)
    out = mod(*args)
    jax.block_until_ready(out)
    ref = _reference(mod, *args)
    assert out.shape == (B, S, cfg.hidden_size)
    # bf16 transit + MXU LayerNorm stats -> loosened tolerance vs f32 reference.
    assert jnp.allclose(out, ref, atol=2e-2, rtol=2e-2), float(
        jnp.max(jnp.abs(out - ref)))

    # Multi-tile + row-padding path: odd seq length, tiny block => grid of 5.
    B2, S2 = 4, 37
    args2 = _make_inputs(kin2, cfg, mod, B2, S2)
    out2 = mod(*args2, block_rows=8)
    jax.block_until_ready(out2)
    ref2 = _reference(mod, *args2)
    assert out2.shape == (B2, S2, cfg.hidden_size)
    assert jnp.allclose(out2, ref2, atol=2e-2, rtol=2e-2), float(
        jnp.max(jnp.abs(out2 - ref2)))

    print("KERNEL_OK")
</pallas_src>

<mosaic_0001>
module attributes {stable_mosaic.version = 11 : i64} {
  func.func @_embed_ln_kernel(%arg0: i32, %arg1: memref<8x128xbf16, #tpu.memory_space<vmem>>, %arg2: memref<8x128xbf16, #tpu.memory_space<vmem>>, %arg3: memref<8x128xbf16, #tpu.memory_space<vmem>>, %arg4: memref<8x128xbf16, #tpu.memory_space<vmem>>, %arg5: memref<8x64xf32, #tpu.memory_space<vmem>>, %arg6: memref<64x128xf32, #tpu.memory_space<vmem>>, %arg7: memref<128x128xf32, #tpu.memory_space<vmem>>, %arg8: memref<1x128xf32, #tpu.memory_space<vmem>>, %arg9: memref<1x128xf32, #tpu.memory_space<vmem>>, %arg10: memref<8x128xf32, #tpu.memory_space<vmem>>) attributes {dimension_semantics = [#tpu.dimension_semantics<parallel>], iteration_bounds = array<i64: 1>, scalar_prefetch = 0 : i64, scratch_operands = 0 : i64, tpu.core_type = #tpu.core_type<tc>, window_params = [{transform_indices = @transform_0, window_bounds = array<i64: 8, 128>}, {transform_indices = @transform_1, window_bounds = array<i64: 8, 128>}, {transform_indices = @transform_2, window_bounds = array<i64: 8, 128>}, {transform_indices = @transform_3, window_bounds = array<i64: 8, 128>}, {transform_indices = @transform_4, window_bounds = array<i64: 8, 64>}, {pipeline_mode = #tpu.pipeline_mode<synchronous>, transform_indices = @transform_5, window_bounds = array<i64: 64, 128>}, {pipeline_mode = #tpu.pipeline_mode<synchronous>, transform_indices = @transform_6, window_bounds = array<i64: 128, 128>}, {pipeline_mode = #tpu.pipeline_mode<synchronous>, transform_indices = @transform_7, window_bounds = array<i64: 1, 128>}, {pipeline_mode = #tpu.pipeline_mode<synchronous>, transform_indices = @transform_8, window_bounds = array<i64: 1, 128>}, {transform_indices = @transform_9, window_bounds = array<i64: 8, 128>}]} {
    %c0 = arith.constant 0 : index
    %c0_0 = arith.constant 0 : index
    %0 = vector.load %arg5[%c0, %c0_0] : memref<8x64xf32, #tpu.memory_space<vmem>>, vector<8x64xf32>
    %c0_1 = arith.constant 0 : index
    %c0_2 = arith.constant 0 : index
    %1 = vector.load %arg6[%c0_1, %c0_2] : memref<64x128xf32, #tpu.memory_space<vmem>>, vector<64x128xf32>
    %cst = arith.constant dense<0.000000e+00> : vector<8x128xf32>
    %2 = tpu.matmul %0, %1, %cst {dimension_numbers = #tpu.dot_dimension_numbers<[1], [0], [0], [1], [0, 0, 1, 1], [], []>} : vector<8x64xf32>, vector<64x128xf32>, vector<8x128xf32> -> vector<8x128xf32>
    %c0_3 = arith.constant 0 : index
    %c0_4 = arith.constant 0 : index
    %3 = vector.load %arg1[%c0_3, %c0_4] : memref<8x128xbf16, #tpu.memory_space<vmem>>, vector<8x128xbf16>
    %4 = arith.extf %3 : vector<8x128xbf16> to vector<8x128xf32>
    %c0_5 = arith.constant 0 : index
    %c0_6 = arith.constant 0 : index
    %5 = vector.load %arg2[%c0_5, %c0_6] : memref<8x128xbf16, #tpu.memory_space<vmem>>, vector<8x128xbf16>
    %6 = arith.extf %5 : vector<8x128xbf16> to vector<8x128xf32>
    %7 = arith.addf %4, %6 : vector<8x128xf32>
    %c0_7 = arith.constant 0 : index
    %c0_8 = arith.constant 0 : index
    %8 = vector.load %arg3[%c0_7, %c0_8] : memref<8x128xbf16, #tpu.memory_space<vmem>>, vector<8x128xbf16>
    %9 = arith.extf %8 : vector<8x128xbf16> to vector<8x128xf32>
    %10 = arith.addf %7, %9 : vector<8x128xf32>
    %c0_9 = arith.constant 0 : index
    %c0_10 = arith.constant 0 : index
    %11 = vector.load %arg4[%c0_9, %c0_10] : memref<8x128xbf16, #tpu.memory_space<vmem>>, vector<8x128xbf16>
    %12 = arith.extf %11 : vector<8x128xbf16> to vector<8x128xf32>
    %13 = arith.addf %10, %12 : vector<8x128xf32>
    %14 = arith.addf %13, %2 : vector<8x128xf32>
    %c0_11 = arith.constant 0 : index
    %c0_12 = arith.constant 0 : index
    %15 = vector.load %arg7[%c0_11, %c0_12] : memref<128x128xf32, #tpu.memory_space<vmem>>, vector<128x128xf32>
    %cst_13 = arith.constant dense<0.000000e+00> : vector<8x128xf32>
    %16 = tpu.matmul %14, %15, %cst_13 {dimension_numbers = #tpu.dot_dimension_numbers<[1], [0], [0], [1], [0, 0, 1, 1], [], []>} : vector<8x128xf32>, vector<128x128xf32>, vector<8x128xf32> -> vector<8x128xf32>
    %17 = arith.subf %14, %16 : vector<8x128xf32>
    %18 = arith.mulf %17, %17 : vector<8x128xf32>
    %c0_14 = arith.constant 0 : index
    %c0_15 = arith.constant 0 : index
    %19 = vector.load %arg7[%c0_14, %c0_15] : memref<128x128xf32, #tpu.memory_space<vmem>>, vector<128x128xf32>
    %cst_16 = arith.constant dense<0.000000e+00> : vector<8x128xf32>
    %20 = tpu.matmul %18, %19, %cst_16 {dimension_numbers = #tpu.dot_dimension_numbers<[1], [0], [0], [1], [0, 0, 1, 1], [], []>} : vector<8x128xf32>, vector<128x128xf32>, vector<8x128xf32> -> vector<8x128xf32>
    %cst_17 = arith.constant 9.99999997E-7 : f32
    %21 = vector.broadcast %cst_17 : f32 to vector<8x128xf32>
    %22 = arith.addf %20, %21 : vector<8x128xf32>
    %23 = math.rsqrt %22 : vector<8x128xf32>
    %24 = arith.mulf %17, %23 : vector<8x128xf32>
    %c0_18 = arith.constant 0 : index
    %c0_19 = arith.constant 0 : index
    %25 = vector.load %arg8[%c0_18, %c0_19] : memref<1x128xf32, #tpu.memory_space<vmem>>, vector<1x128xf32>
    %26 = vector.broadcast %25 : vector<1x128xf32> to vector<8x128xf32>
    %27 = arith.mulf %24, %26 : vector<8x128xf32>
    %c0_20 = arith.constant 0 : index
    %c0_21 = arith.constant 0 : index
    %28 = vector.load %arg9[%c0_20, %c0_21] : memref<1x128xf32, #tpu.memory_space<vmem>>, vector<1x128xf32>
    %29 = vector.broadcast %28 : vector<1x128xf32> to vector<8x128xf32>
    %30 = arith.addf %27, %29 : vector<8x128xf32>
    %c0_22 = arith.constant 0 : index
    %c0_23 = arith.constant 0 : index
    %31 = vector.load %arg10[%c0_22, %c0_23] : memref<8x128xf32, #tpu.memory_space<vmem>>, vector<8x128xf32>
    tpu.vector_store %arg10[%c0_22, %c0_23], %30 {strides = array<i32>} : memref<8x128xf32, #tpu.memory_space<vmem>>, vector<8x128xf32>,
    return
  }
  func.func @transform_0(%arg0: i32) -> (i32, i32) {
    %c0_i32 = arith.constant 0 : i32
    %c0_i32_0 = arith.constant 0 : i32
    return %arg0, %c0_i32 : i32, i32
  }
  func.func @transform_1(%arg0: i32) -> (i32, i32) {
    %c0_i32 = arith.constant 0 : i32
    %c0_i32_0 = arith.constant 0 : i32
    return %arg0, %c0_i32 : i32, i32
  }
  func.func @transform_2(%arg0: i32) -> (i32, i32) {
    %c0_i32 = arith.constant 0 : i32
    %c0_i32_0 = arith.constant 0 : i32
    return %arg0, %c0_i32 : i32, i32
  }
  func.func @transform_3(%arg0: i32) -> (i32, i32) {
    %c0_i32 = arith.constant 0 : i32
    %c0_i32_0 = arith.constant 0 : i32
    return %arg0, %c0_i32 : i32, i32
  }
  func.func @transform_4(%arg0: i32) -> (i32, i32) {
    %c0_i32 = arith.constant 0 : i32
    %c0_i32_0 = arith.constant 0 : i32
    return %arg0, %c0_i32 : i32, i32
  }
  func.func @transform_5(%arg0: i32) -> (i32, i32) {
    %c0_i32 = arith.constant 0 : i32
    %c0_i32_0 = arith.constant 0 : i32
    %c0_i32_1 = arith.constant 0 : i32
    return %c0_i32, %c0_i32_0 : i32, i32
  }
  func.func @transform_6(%arg0: i32) -> (i32, i32) {
    %c0_i32 = arith.constant 0 : i32
    %c0_i32_0 = arith.constant 0 : i32
    %c0_i32_1 = arith.constant 0 : i32
    return %c0_i32, %c0_i32_0 : i32, i32
  }
  func.func @transform_7(%arg0: i32) -> (i32, i32) {
    %c0_i32 = arith.constant 0 : i32
    %c0_i32_0 = arith.constant 0 : i32
    %c0_i32_1 = arith.constant 0 : i32
    return %c0_i32, %c0_i32_0 : i32, i32
  }
  func.func @transform_8(%arg0: i32) -> (i32, i32) {
    %c0_i32 = arith.constant 0 : i32
    %c0_i32_0 = arith.constant 0 : i32
    %c0_i32_1 = arith.constant 0 : i32
    return %c0_i32, %c0_i32_0 : i32, i32
  }
  func.func @transform_9(%arg0: i32) -> (i32, i32) {
    %c0_i32 = arith.constant 0 : i32
    %c0_i32_0 = arith.constant 0 : i32
    return %arg0, %c0_i32 : i32, i32
  }
}

</mosaic_0001>

<bundles_post_ra>
// kernel: tpu_custom_call.1
= control target key start
LH: loop header
LB: loop body
LE: loop exit
PB: predicated region body
PF: predicated region fallthrough
CT: control target
= control target key end

     0   :  { %14 = vsyncpa [#allocation3], 0  ;;  %s913_s0 = inlined_call_operand.hbm [shape: bf16[8,128], index: 0, kind: input, shape index: {}]   ;;  %s914_s1 = inlined_call_operand.hbm [shape: bf16[8,128], index: 1, kind: input, shape index: {}]   ;;  %s915_s2 = inlined_call_operand.vmem [shape: bf16[8,128], index: 2, kind: input, shape index: {}]   ;;  %s916_s3 = inlined_call_operand.hbm [shape: bf16[8,128], index: 3, kind: input, shape index: {}]   ;;  %s917_s4 = inlined_call_operand.vmem [shape: f32[8,64], index: 4, kind: input, shape index: {}]   ;;  %s918_s5 = inlined_call_operand.hbm [shape: f32[64,128], index: 5, kind: input, shape index: {}]   ;;  %s919_s6 = inlined_call_operand.hbm [shape: f32[128,128], index: 6, kind: input, shape index: {}]   ;;  %s920_s7 = inlined_call_operand.vmem [shape: f32[1,128], index: 7, kind: input, shape index: {}]   ;;  %s921_s8 = inlined_call_operand.vmem [shape: f32[1,128], index: 8, kind: input, shape index: {}]   ;;  %s922_s9 = inlined_call_operand.hbm [shape: f32[8,128], index: 9, kind: output, shape index: {}]  }
   0x1   :  { %15 = vsyncpa [#allocation6], 0 }
   0x2   :  { %16 = vsyncpa [#allocation9], 0 }
   0x3   :  { %17 = vsyncpa [#allocation4], 0  ;;  %s732_s30 = smov [#allocation5]   ;;  %s733_s11 = smov [#allocation8]  }
   0x4   :  { %s34_s10 = sshll.u32 %s732_s30, 4  ;;  %s57_s12 = sshll.u32 %s733_s11, 4  ;;  %s35_s10 = int_to_ptr.vmem [resolvable:$true] %s34_s10  ;;  %s793_s12 = int_to_ptr.vmem [resolvable:$true] %s57_s12 }
   0x5   :  { %s592_s15 = scalar_lea.hbm %s914_s1, 64 }
   0x6   :  { %p593_p0 = scmp.ne.s32.totalorder %s914_s1, %s592_s15  ;;  %p596_p1 = scmp.lt.u32.totalorder %s592_s15, %s914_s1 }
   0x8   :  { %p598_p2 = pnand %p596_p1, %p593_p0 }
   0xa   :  { %601 = shalt.err (!%p598_p2)
}
   0xb   :  { %s602_s20 = scalar_lea.vmem %s35_s10, 64  ;;  %p607_p4 = scmp.lt.s32.totalorder %s35_s10, %s35_s10 }
   0xc   :  { %p603_p3 = scmp.ne.s32.totalorder %s35_s10, %s602_s20  ;;  %p608_p5 = scmp.lt.s32.totalorder %s602_s20, %s602_s20 }
   0xe   :  { %p609_p6 = por %p608_p5, %p607_p4 }
  0x10   :  { %p610_p7 = pnand %p609_p6, %p603_p3 }
  0x12   :  { %613 = shalt.err (!%p610_p7)
}
  0x13   :  { %37 = dma.hbm_to_vmem [thread:$0]  %s914_s1, 64, %s35_s10, [#allocation6]  }
  0x14   :  { %s614_s25 = scalar_lea.hbm %s918_s5, 1024 }
  0x15   :  { %p615_p8 = scmp.ne.s32.totalorder %s918_s5, %s614_s25  ;;  %p618_p9 = scmp.lt.u32.totalorder %s614_s25, %s918_s5 }
  0x17   :  { %p620_p10 = pnand %p618_p9, %p615_p8 }
  0x19   :  { %623 = shalt.err (!%p620_p10)
}
  0x1a   :  { %s624_s30 = scalar_lea.vmem %s793_s12, 1024  ;;  %p629_p12 = scmp.lt.s32.totalorder %s793_s12, %s793_s12 }
  0x1b   :  { %p625_p11 = scmp.ne.s32.totalorder %s793_s12, %s624_s30  ;;  %p630_p13 = scmp.lt.s32.totalorder %s624_s30, %s624_s30 }
  0x1d   :  { %p631_p0 = por %p630_p13, %p629_p12 }
  0x1f   :  { %p632_p1 = pnand %p631_p0, %p625_p11 }
  0x21   :  { %635 = shalt.err (!%p632_p1)
}
  0x22   :  { %s734_s1 = smov 128   ;;  %s735_s10 = smov 8  }
  0x23   :  { %63 = dma.hbm_to_vmem [thread:$0]  %s918_s5, 1024, %s793_s12, [#allocation9], %s734_s1, %s734_s1, %s735_s10  }
  0x24   :  { %s736_s14 = smov [#allocation2]   ;;  %s737_s16 = smov [#allocation7]  }
  0x25   :  { %s24_s15 = sshll.u32 %s736_s14, 4  ;;  %s46_s17 = sshll.u32 %s737_s16, 4  ;;  %s25_s15 = int_to_ptr.vmem [resolvable:$true] %s24_s15  ;;  %s47_s17 = int_to_ptr.vmem [resolvable:$true] %s46_s17 }
  0x26   :  { %s636_s20 = scalar_lea.hbm %s913_s0, 64 }
  0x27   :  { %p637_p2 = scmp.ne.s32.totalorder %s913_s0, %s636_s20  ;;  %p640_p3 = scmp.lt.u32.totalorder %s636_s20, %s913_s0 }
  0x29   :  { %p642_p4 = pnand %p640_p3, %p637_p2 }
  0x2b   :  { %645 = shalt.err (!%p642_p4)
}
  0x2c   :  { %s646_s5 = scalar_lea.vmem %s25_s15, 64  ;;  %p651_p6 = scmp.lt.s32.totalorder %s25_s15, %s25_s15 }
  0x2d   :  { %p647_p5 = scmp.ne.s32.totalorder %s25_s15, %s646_s5  ;;  %p652_p7 = scmp.lt.s32.totalorder %s646_s5, %s646_s5 }
  0x2f   :  { %p653_p8 = por %p652_p7, %p651_p6 }
  0x31   :  { %p654_p9 = pnand %p653_p8, %p647_p5 }
  0x33   :  { %657 = shalt.err (!%p654_p9)
}
  0x34   :  { %27 = dma.hbm_to_vmem [thread:$0]  %s913_s0, 64, %s25_s15, [#allocation3]  }
  0x35   :  { %s658_s28 = scalar_lea.hbm %s916_s3, 64 }
  0x36   :  { %p659_p10 = scmp.ne.s32.totalorder %s916_s3, %s658_s28  ;;  %p662_p11 = scmp.lt.u32.totalorder %s658_s28, %s916_s3 }
  0x38   :  { %p664_p12 = pnand %p662_p11, %p659_p10 }
  0x3a   :  { %667 = shalt.err (!%p664_p12)
}
  0x3b   :  { %s668_s14 = scalar_lea.vmem %s47_s17, 64  ;;  %p673_p0 = scmp.lt.s32.totalorder %s47_s17, %s47_s17 }
  0x3c   :  { %p669_p13 = scmp.ne.s32.totalorder %s47_s17, %s668_s14  ;;  %p674_p1 = scmp.lt.s32.totalorder %s668_s14, %s668_s14 }
  0x3e   :  { %p675_p2 = por %p674_p1, %p673_p0 }
  0x40   :  { %p676_p3 = pnand %p675_p2, %p669_p13 }
  0x42   :  { %679 = shalt.err (!%p676_p3)
}
  0x43   :  { %49 = dma.hbm_to_vmem [thread:$0]  %s916_s3, 64, %s47_s17, [#allocation6]  }
  0x44   :  { %s738_s16 = smov [#allocation10]   ;;  %s680_s21 = scalar_lea.hbm %s919_s6, 2048 }
  0x45   :  { %s69_s18 = sshll.u32 %s738_s16, 4  ;;  %p681_p4 = scmp.ne.s32.totalorder %s919_s6, %s680_s21  ;;  %s70_s18 = int_to_ptr.vmem [resolvable:$true] %s69_s18 }
  0x46   :  { %p684_p5 = scmp.lt.u32.totalorder %s680_s21, %s919_s6 }
  0x48   :  { %p686_p6 = pnand %p684_p5, %p681_p4 }
  0x4a   :  { %689 = shalt.err (!%p686_p6)
}
  0x4b   :  { %s690_s12 = scalar_lea.vmem %s70_s18, 2048  ;;  %p695_p8 = scmp.lt.s32.totalorder %s70_s18, %s70_s18 }
  0x4c   :  { %p691_p7 = scmp.ne.s32.totalorder %s70_s18, %s690_s12  ;;  %p696_p9 = scmp.lt.s32.totalorder %s690_s12, %s690_s12 }
  0x4e   :  { %p697_p10 = por %p696_p9, %p695_p8 }
  0x50   :  { %p698_p11 = pnand %p697_p10, %p691_p7 }
  0x52   :  { %701 = shalt.err (!%p698_p11)
}
  0x53   :  { %75 = dma.hbm_to_vmem [thread:$0]  %s919_s6, 2048, %s70_s18, [#allocation9], %s734_s1, %s734_s1, %s735_s10  }
  0x54   :  { %724 = dma.done.wait [#allocation3], 64  }
  0x55   :  { %725 = vsyncadd [#allocation3], 4294967232 }
  0x56   :  { %726 = dma.done.wait [#allocation6], 128  }
  0x57   :  { %727 = vsyncadd [#allocation6], 4294967168 }
  0x58   :  { %728 = dma.done.wait [#allocation9], 3072  }
  0x59   :  { %729 = vsyncadd [#allocation9], 4294964224  ;;  %v739_v0 = vmov 0.0|0.0   ;;  %vm740_vm0 = vmmov 0   ;;  %v741_v1 = vmov 0.0   ;;  %v96_v2 = vld [vmem:[#allocation8] sm:$0xff] }
  0x5a   :  { %519 = vmatprep.subr.bf16.mxu0 %v739_v0  ;;  %446 = vmatprep.mubr.msk.f32.mxu0 %vm740_vm0, %v741_v1  ;;  %v97_v3 = vld [vmem:[#allocation8 + $0x8] sm:$0xff]  ;;  %v98_v4 = vld [vmem:[#allocation8 + $0x10] sm:$0xff]  ;;  %v99_v6 = vld [vmem:[#allocation8 + $0x18] sm:$0xff]  ;;  %vm104_vm1 = vcmask 523264   ;;  %s742_s28 = smov [#allocation11]  }
  0x5b   :  { %531 = vmatprep.subr.bf16.mxu1 %v739_v0  ;;  %481 = vmatprep.mubr.msk.f32.mxu1 %vm740_vm0, %v741_v1  ;;  %v520_v5 = vpack.c.bf16 %v97_v3, %v96_v2  ;;  %v523_v7 = vpack.c.bf16 %v99_v6, %v98_v4  ;;  %v190_v8 = vld [vmem:[#allocation10] sm:$0xff]  ;;  %v191_v9 = vld [vmem:[#allocation10 + $0x8] sm:$0xff]  ;;  %v192_v10 = vld [vmem:[#allocation10 + $0x10] sm:$0xff]  ;;  %s373_s29 = sshll.u32 %s742_s28, 4  ;;  %s374_s29 = int_to_ptr.vmem [resolvable:$true] %s373_s29 }
  0x5c   :  { %v100_v11 = vld [vmem:[#allocation8 + $0x20] sm:$0xff]  ;;  %v101_v12 = vld [vmem:[#allocation8 + $0x28] sm:$0xff]  ;;  %v532_v13 = vpack.c.bf16 %v191_v9, %v190_v8  ;;  %v193_v14 = vld [vmem:[#allocation10 + $0x18] sm:$0xff]  ;;  %s702_s30 = scalar_lea.vmem %s374_s29, 128  ;;  %p707_p13 = scmp.lt.s32.totalorder %s374_s29, %s374_s29 }
  0x5d   :  { %521 = vmatpush3.bf16.msra.mxu0 %v520_v5  ;;  %v535_v15 = vpack.c.bf16 %v193_v14, %v192_v10  ;;  %v526_v16 = vpack.c.bf16 %v101_v12, %v100_v11  ;;  %v194_v17 = vld [vmem:[#allocation10 + $0x20] sm:$0xff]  ;;  %v195_v18 = vld [vmem:[#allocation10 + $0x28] sm:$0xff]  ;;  %v102_v19 = vld [vmem:[#allocation8 + $0x30] sm:$0xff]  ;;  %p703_p12 = scmp.ne.s32.totalorder %s374_s29, %s702_s30  ;;  %p708_p0 = scmp.lt.s32.totalorder %s702_s30, %s702_s30 }
  0x5e   :  { %522 = vmatprep.subr.bf16.mxu0 %v739_v0  ;;  %533 = vmatpush3.bf16.msra.mxu1 %v532_v13  ;;  %v103_v20 = vld [vmem:[#allocation8 + $0x38] sm:$0xff]  ;;  %v538_v21 = vpack.c.bf16 %v195_v18, %v194_v17  ;;  %v196_v23 = vld [vmem:[#allocation10 + $0x30] sm:$0xff]  ;;  %v198_v27 = vld [vmem:[#allocation10 + $0x40] sm:$0xff] }
  0x5f   :  { %534 = vmatprep.subr.bf16.mxu1 %v739_v0  ;;  %v529_v22 = vpack.c.bf16 %v103_v20, %v102_v19  ;;  %v197_v24 = vld [vmem:[#allocation10 + $0x38] sm:$0xff]  ;;  %v95_v26 = vld [vmem:[%s917_s4] sm:$0xff]  ;;  %v202_v33 = vld [vmem:[#allocation10 + $0x60] sm:$0xff]  ;;  %p709_p1 = por %p708_p0, %p707_p13 }
  0x60   :  { %v541_v25 = vpack.c.bf16 %v197_v24, %v196_v23  ;;  %v199_v28 = vld [vmem:[#allocation10 + $0x48] sm:$0xff]  ;;  %v200_v30 = vld [vmem:[#allocation10 + $0x50] sm:$0xff]  ;;  %v201_v31 = vld [vmem:[#allocation10 + $0x58] sm:$0xff] }
  0x61   :  { %524 = vmatpush3.bf16.msra.mxu0 %v523_v7  ;;  %v544_v29 = vpack.c.bf16 %v199_v28, %v198_v27  ;;  %v547_v32 = vpack.c.bf16 %v201_v31, %v200_v30  ;;  %v203_v34 = vld [vmem:[#allocation10 + $0x68] sm:$0xff]  ;;  %v204_v36 = vld [vmem:[#allocation10 + $0x70] sm:$0xff]  ;;  %v205_v37 = vld [vmem:[#allocation10 + $0x78] sm:$0xff]  ;;  %p710_p2 = pnand %p709_p1, %p703_p12 }
  0x62   :  { %525 = vmatprep.subr.bf16.mxu0 %v739_v0  ;;  %536 = vmatpush3.bf16.msra.mxu1 %v535_v15  ;;  %v550_v35 = vpack.c.bf16 %v203_v34, %v202_v33  ;;  %v553_v38 = vpack.c.bf16 %v205_v37, %v204_v36  ;;  %v178_v39 = vld [vmem:[#allocation2] sm:$0xf]  ;;  %v180_v40 = vld [vmem:[#allocation5] sm:$0xf]  ;;  %v183_v43 = vld [vmem:[%s915_s2] sm:$0xf] }
  0x63   :  { %537 = vmatprep.subr.bf16.mxu1 %v739_v0  ;;  %v179_v41 = vunpack.c.l.bf16 %v178_v39  ;;  %v181_v42 = vunpack.c.l.bf16 %v180_v40  ;;  %v184_v45 = vunpack.c.l.bf16 %v183_v43  ;;  %v186_v46 = vld [vmem:[#allocation7] sm:$0xf]  ;;  %v385_v61 = vld [vmem:[%s920_s7] ss:$0 sm:$0xff] }
  0x64   :  { %v187_v48 = vunpack.c.l.bf16 %v186_v46  ;;  %v386_v63 = vld [vmem:[%s921_s8] ss:$0 sm:$0xff] }
  0x65   :  { %527 = vmatpush3.bf16.msra.mxu0 %v526_v16  ;;  %v182_v44 = vadd.f32 %v181_v42, %v179_v41 }
  0x66   :  { %528 = vmatprep.subr.bf16.mxu0 %v739_v0  ;;  %539 = vmatpush3.bf16.msra.mxu1 %v538_v21 }
  0x67   :  { %540 = vmatprep.subr.bf16.mxu1 %v739_v0  ;;  %v185_v47 = vadd.f32 %v184_v45, %v182_v44 }
  0x69   :  { %530 = vmatpush3.bf16.msra.mxu0 %v529_v22  ;;  %v188_v49 = vadd.f32 %v187_v48, %v185_v47 }
  0x6a   :  { %555 = vmatprep.subr.bf16.mxu0 %v739_v0  ;;  %542 = vmatpush3.bf16.msra.mxu1 %v541_v25 }
  0x6b   :  { %543 = vmatprep.subr.bf16.mxu1 %v739_v0 }
  0x6c   :  { %447 = vmatmul.mubr.msk.f32.vlgmr.msra.gmra.mrb[0].mxu0 %vm104_vm1, %v95_v26 }
  0x6d   :  { %557 = vmatpush3.bf16.msra.mxu0 %v532_v13  ;;  %516 = vmatprep.mubr.msk.f32.mxu0 %vm740_vm0, %v741_v1 }
  0x6e   :  { %558 = vmatprep.subr.bf16.mxu0 %v739_v0  ;;  %545 = vmatpush3.bf16.msra.mxu1 %v544_v29 }
  0x6f   :  { %546 = vmatprep.subr.bf16.mxu1 %v739_v0 }
  0x71   :  { %560 = vmatpush3.bf16.msra.mxu0 %v535_v15 }
  0x72   :  { %561 = vmatprep.subr.bf16.mxu0 %v739_v0  ;;  %548 = vmatpush3.bf16.msra.mxu1 %v547_v32 }
  0x73   :  { %549 = vmatprep.subr.bf16.mxu1 %v739_v0 }
  0x75   :  { %563 = vmatpush3.bf16.msra.mxu0 %v538_v21 }
  0x76   :  { %564 = vmatprep.subr.bf16.mxu0 %v739_v0  ;;  %551 = vmatpush3.bf16.msra.mxu1 %v550_v35 }
  0x77   :  { %552 = vmatprep.subr.bf16.mxu1 %v739_v0 }
  0x79   :  { %566 = vmatpush3.bf16.msra.mxu0 %v541_v25 }
  0x7a   :  { %567 = vmatprep.subr.bf16.mxu0 %v739_v0  ;;  %554 = vmatpush3.bf16.msra.mxu1 %v553_v38 }
  0x7d   :  { %569 = vmatpush3.bf16.msra.mxu0 %v544_v29 }
  0x7e   :  { %570 = vmatprep.subr.bf16.mxu0 %v739_v0 }
  0x81   :  { %572 = vmatpush3.bf16.msra.mxu0 %v547_v32 }
  0x82   :  { %573 = vmatprep.subr.bf16.mxu0 %v739_v0 }
  0x85   :  { %575 = vmatpush3.bf16.msra.mxu0 %v550_v35 }
  0x86   :  { %576 = vmatprep.subr.bf16.mxu0 %v739_v0 }
  0x89   :  { %578 = vmatpush3.bf16.msra.mxu0 %v553_v38 }
 0x13f   :  { %v174_v50 = vpop.f32.mrb[0].mxu0 }
 0x140   :  { %v189_v51 = vadd.f32 %v188_v49, %v174_v50  ;;  %v448_v52 = vpop.f32.mrb[1].mxu0 }
 0x142   :  { %482 = vmatmul.mubr.f32.vlgmr.msra.gmra.mrb[0].mxu1 %v189_v51 }
 0x215   :  { %v272_v53 = vpop.f32.mrb[0].mxu1 }
 0x216   :  { %v276_v54 = vsub.f32 %v189_v51, %v272_v53  ;;  %v483_v55 = vpop.f32.mrb[1].mxu1 }
 0x218   :  { %v277_v56 = vmul.f32 %v276_v54, %v276_v54 }
 0x21a   :  { %517 = vmatmul.mubr.f32.vlgmr.msra.gmra.mrb[2].mxu0 %v277_v56 }
 0x2ed   :  { %v344_v57 = vpop.f32.mrb[2].mxu0 }
 0x2ee   :  { %v345_v58 = vadd.f32 1e-06, %v344_v57  ;;  %v518_v59 = vpop.f32.mrb[3].mxu0 }
 0x2f0   :  { %590 = vrsqrt.f32 %v345_v58 }
 0x2fa   :  { %v591_v60 = vpop.eup %590 }
 0x2fb   :  { %v349_v62 = vmul.f32 %v591_v60, %v276_v54 }
 0x2fd   :  { %v357_v0 = vmul.f32 %v385_v61, %v349_v62 }
 0x2ff   :  { %v365_v1 = vadd.f32 %v386_v63, %v357_v0 }
 0x301   :  { %366 = vst [vmem:[#allocation11] sm:$0xff] %v365_v1 }
 0x302   :  { %713 = shalt.err (!%p710_p2)
}
 0x303   :  { %s714_s13 = scalar_lea.hbm %s922_s9, 128 }
 0x304   :  { %p715_p3 = scmp.ne.s32.totalorder %s922_s9, %s714_s13  ;;  %p718_p4 = scmp.lt.u32.totalorder %s714_s13, %s922_s9 }
 0x306   :  { %p720_p5 = pnand %p718_p4, %p715_p3 }
 0x308   :  { %723 = shalt.err (!%p720_p5)
}
 0x309   :  { %376 = dma.vmem_to_hbm [thread:$0]  %s374_s29, 128, %s922_s9, [#allocation4]  }
 0x30a   :  { %730 = dma.done.wait [#allocation4], 128  }
 0x30b   :  { %731 = vsyncadd [#allocation4], 4294967168 }
 0x30c   :  { %380 = vsyncpa [#allocation3], 1 }
 0x30d   :  { %381 = vsyncpa [#allocation6], 1 }
 0x30e   :  { %382 = vsyncpa [#allocation9], 1 }
 0x30f   :  { %383 = vsyncpa [#allocation4], 1 }

</bundles_post_ra>
